<compile_context>
chip_gen: v5e
topology: v5e:2x2
jax: 0.10.0
libtpu: 0.0.40
codegen_flags: <defaults>
</compile_context>

<pallas_src>
import jax
import jax.numpy as jnp
from jax.experimental import pallas as pl
from jax.experimental.pallas import tpu as pltpu

SUBLANE = 8   # vreg sublane width (second-to-last dim)


def _round_up(n, m):
    return (n + m - 1) // m * m


def dqn_kernel(x_ref, w1_ref, b1_ref, w2_ref, b2_ref, w3_ref, b3_ref, o_ref):
    # Hot path: 3 MXU matmuls + f32 bias adds + f32 ReLUs, fully fused in VMEM.
    # Matmul operands are in compute_dtype (f32 or bf16); accumulation and all
    # element-wise work stay f32.
    x = x_ref[...]
    h1 = jnp.dot(x, w1_ref[...], preferred_element_type=jnp.float32) + b1_ref[...]
    h1 = jnp.maximum(h1, 0.0).astype(w2_ref.dtype)
    h2 = jnp.dot(h1, w2_ref[...], preferred_element_type=jnp.float32) + b2_ref[...]
    h2 = jnp.maximum(h2, 0.0).astype(w3_ref.dtype)
    out = jnp.dot(h2, w3_ref[...], preferred_element_type=jnp.float32) + b3_ref[...]
    o_ref[...] = out.astype(o_ref.dtype)


def _pick_batch_tile(B):
    """Sublane-aligned batch tile.

    Per-row traffic is only ~0.1 KB once nothing is lane-padded, so large tiles
    (up to 2048 rows) amortize the ~0.35 us per-grid-step overhead.  For small
    and medium batches, split into two roughly equal tiles so the pipeline
    double-buffers and both v7x TensorCores get a step each.
    """
    b8 = _round_up(max(B, 1), SUBLANE)
    if b8 <= SUBLANE:
        return SUBLANE
    if b8 <= 2 * 2048:
        return max(SUBLANE, _round_up(pl.cdiv(b8, 2), SUBLANE))
    return 2048


def prepare_dqn_params(params, compute_dtype=jnp.float32):
    """One-time (cached) parameter preparation: cast weights to compute_dtype,
    keep biases in f32 as (1, h) rows.  No per-forward-call transformations."""
    def _bias2d(b):
        return jnp.asarray(b, jnp.float32).reshape(1, -1)
    return {
        "w1": jnp.asarray(params["w1"], compute_dtype),
        "b1": _bias2d(params["b1"]),
        "w2": jnp.asarray(params["w2"], compute_dtype),
        "b2": _bias2d(params["b2"]),
        "w3": jnp.asarray(params["w3"], compute_dtype),
        "b3": _bias2d(params["b3"]),
        "_compute_dtype": compute_dtype,
    }


def dqn_forward(x, prepared, *, batch_tile=None):
    """Fused DQN MLP forward on TPU.

    x: (B, input_dim) array
    prepared: output of prepare_dqn_params (weights already in compute dtype)
    """
    compute_dtype = prepared["_compute_dtype"]
    w1, b1 = prepared["w1"], prepared["b1"]
    w2, b2 = prepared["w2"], prepared["b2"]
    w3, b3 = prepared["w3"], prepared["b3"]

    B, input_dim = x.shape
    h1_dim = w1.shape[1]
    h2_dim = w2.shape[1]
    out_dim = w3.shape[1]

    if batch_tile is None:
        batch_tile = _pick_batch_tile(B)
    batch_tile = max(SUBLANE, _round_up(batch_tile, SUBLANE))
    grid = (pl.cdiv(B, batch_tile),)

    x = x.astype(compute_dtype)  # no-op for f32; single cast for bf16

    # Full-array last dims (input_dim / h1 / h2 / out_dim) are legal block
    # shapes, so nothing is zero-padded to 128 lanes; weights/biases use a
    # constant (0, 0) block index and stay VMEM-resident across grid steps.
    in_specs = [
        pl.BlockSpec((batch_tile, input_dim), lambda i: (i, 0)),   # x tile (pipelined)
        pl.BlockSpec((input_dim, h1_dim), lambda i: (0, 0)),
        pl.BlockSpec((1, h1_dim), lambda i: (0, 0)),
        pl.BlockSpec((h1_dim, h2_dim), lambda i: (0, 0)),
        pl.BlockSpec((1, h2_dim), lambda i: (0, 0)),
        pl.BlockSpec((h2_dim, out_dim), lambda i: (0, 0)),
        pl.BlockSpec((1, out_dim), lambda i: (0, 0)),
    ]
    out_specs = pl.BlockSpec((batch_tile, out_dim), lambda i: (i, 0))

    # Honest VMEM accounting: double-buffered x/out tiles + f32 activations +
    # double-buffered (tiny) weights + headroom.  Stays a few MiB — well under
    # v5e's 16 MiB default scoped VMEM and v7x's 64 MiB physical VMEM.
    itemsize = jnp.dtype(compute_dtype).itemsize
    x_tile_bytes = batch_tile * input_dim * itemsize
    out_tile_bytes = batch_tile * out_dim * 4
    act_bytes = batch_tile * (h1_dim + h2_dim) * 4
    w_bytes = (input_dim * h1_dim + h1_dim * h2_dim + h2_dim * out_dim) * itemsize \
        + (h1_dim + h2_dim + out_dim) * 4
    vmem_limit = int(min(32 << 20,
                         max(8 << 20,
                             2 * (x_tile_bytes + out_tile_bytes)
                             + act_bytes + 2 * w_bytes + (2 << 20))))

    return pl.pallas_call(
        dqn_kernel,
        out_shape=jax.ShapeDtypeStruct((B, out_dim), jnp.float32),
        grid_spec=pl.GridSpec(
            grid=grid,
            in_specs=in_specs,
            out_specs=out_specs,
        ),
        compiler_params=pltpu.CompilerParams(
            dimension_semantics=("parallel",),
            vmem_limit_bytes=vmem_limit,
        ),
    )(x, w1, b1, w2, b2, w3, b3)


def init_dqn_params(key, input_dim, output_dim):
    """Deterministic init mimicking PyTorch Linear default (U[-1/sqrt(fan_in), +])."""
    dims = [(input_dim, 64), (64, 32), (32, output_dim)]
    params = {}
    for idx, (fan_in, fan_out) in enumerate(dims, start=1):
        key, kw, kb = jax.random.split(key, 3)
        bound = 1.0 / jnp.sqrt(jnp.float32(fan_in))
        params[f"w{idx}"] = jax.random.uniform(
            kw, (fan_in, fan_out), jnp.float32, -bound, bound)
        params[f"b{idx}"] = jax.random.uniform(
            kb, (1, fan_out), jnp.float32, -bound, bound)
    return params


def dqn_reference(x, params):
    h1 = jnp.maximum(x @ params["w1"] + params["b1"], 0.0)
    h2 = jnp.maximum(h1 @ params["w2"] + params["b2"], 0.0)
    return h2 @ params["w3"] + params["b3"]


if __name__ == "__main__":
    key = jax.random.PRNGKey(0)
    key, kx = jax.random.split(key)

    batch = 8
    input_dim = 16   # e.g. state/feature dim of the trading env
    output_dim = 4   # e.g. number of discrete actions

    params = init_dqn_params(key, input_dim, output_dim)
    prepared_f32 = prepare_dqn_params(params, jnp.float32)

    x = jax.random.normal(kx, (batch, input_dim), jnp.float32)
    out = jax.block_until_ready(dqn_forward(x, prepared_f32))
    ref = dqn_reference(x, params)
    assert out.shape == (batch, output_dim)
    assert jnp.allclose(out, ref, atol=1e-5, rtol=1e-5)

    # Multi-step grid with a partial (masked) last block: B=100, tile=56, grid=2.
    key, kx2 = jax.random.split(key)
    x2 = jax.random.normal(kx2, (100, input_dim), jnp.float32)
    out2 = jax.block_until_ready(dqn_forward(x2, prepared_f32))
    ref2 = dqn_reference(x2, params)
    assert out2.shape == (100, output_dim)
    assert jnp.allclose(out2, ref2, atol=1e-5, rtol=1e-5)

    # bf16 matmul operands (f32 accumulation / bias / ReLU): halves x/weight
    # DMA bytes on v5e/v6e/v7x.  Loose tolerance for bf16 input rounding.
    prepared_bf16 = prepare_dqn_params(params, jnp.bfloat16)
    out3 = jax.block_until_ready(dqn_forward(x2, prepared_bf16))
    assert out3.shape == (100, output_dim)
    assert jnp.allclose(out3, ref2, atol=5e-2, rtol=5e-2)

    print("KERNEL_OK")
</pallas_src>

<mosaic_0001>
module attributes {stable_mosaic.version = 11 : i64} {
  func.func @dqn_kernel(%arg0: i32, %arg1: memref<8x16xf32, #tpu.memory_space<vmem>>, %arg2: memref<16x64xf32, #tpu.memory_space<vmem>>, %arg3: memref<1x64xf32, #tpu.memory_space<vmem>>, %arg4: memref<64x32xf32, #tpu.memory_space<vmem>>, %arg5: memref<1x32xf32, #tpu.memory_space<vmem>>, %arg6: memref<32x4xf32, #tpu.memory_space<vmem>>, %arg7: memref<1x4xf32, #tpu.memory_space<vmem>>, %arg8: memref<8x4xf32, #tpu.memory_space<vmem>>) attributes {dimension_semantics = [#tpu.dimension_semantics<parallel>], iteration_bounds = array<i64: 1>, scalar_prefetch = 0 : i64, scratch_operands = 0 : i64, tpu.core_type = #tpu.core_type<tc>, window_params = [{transform_indices = @transform_0, window_bounds = array<i64: 8, 16>}, {pipeline_mode = #tpu.pipeline_mode<synchronous>, transform_indices = @transform_1, window_bounds = array<i64: 16, 64>}, {pipeline_mode = #tpu.pipeline_mode<synchronous>, transform_indices = @transform_2, window_bounds = array<i64: 1, 64>}, {pipeline_mode = #tpu.pipeline_mode<synchronous>, transform_indices = @transform_3, window_bounds = array<i64: 64, 32>}, {pipeline_mode = #tpu.pipeline_mode<synchronous>, transform_indices = @transform_4, window_bounds = array<i64: 1, 32>}, {pipeline_mode = #tpu.pipeline_mode<synchronous>, transform_indices = @transform_5, window_bounds = array<i64: 32, 4>}, {pipeline_mode = #tpu.pipeline_mode<synchronous>, transform_indices = @transform_6, window_bounds = array<i64: 1, 4>}, {transform_indices = @transform_7, window_bounds = array<i64: 8, 4>}]} {
    %c0 = arith.constant 0 : index
    %c0_0 = arith.constant 0 : index
    %0 = vector.load %arg1[%c0, %c0_0] : memref<8x16xf32, #tpu.memory_space<vmem>>, vector<8x16xf32>
    %c0_1 = arith.constant 0 : index
    %c0_2 = arith.constant 0 : index
    %1 = vector.load %arg2[%c0_1, %c0_2] : memref<16x64xf32, #tpu.memory_space<vmem>>, vector<16x64xf32>
    %cst = arith.constant dense<0.000000e+00> : vector<8x64xf32>
    %2 = tpu.matmul %0, %1, %cst {dimension_numbers = #tpu.dot_dimension_numbers<[1], [0], [0], [1], [0, 0, 1, 1], [], []>} : vector<8x16xf32>, vector<16x64xf32>, vector<8x64xf32> -> vector<8x64xf32>
    %c0_3 = arith.constant 0 : index
    %c0_4 = arith.constant 0 : index
    %3 = vector.load %arg3[%c0_3, %c0_4] : memref<1x64xf32, #tpu.memory_space<vmem>>, vector<1x64xf32>
    %4 = vector.broadcast %3 : vector<1x64xf32> to vector<8x64xf32>
    %5 = arith.addf %2, %4 : vector<8x64xf32>
    %cst_5 = arith.constant 0.000000e+00 : f32
    %6 = vector.broadcast %cst_5 : f32 to vector<8x64xf32>
    %7 = arith.maximumf %5, %6 : vector<8x64xf32>
    %c0_6 = arith.constant 0 : index
    %c0_7 = arith.constant 0 : index
    %8 = vector.load %arg4[%c0_6, %c0_7] : memref<64x32xf32, #tpu.memory_space<vmem>>, vector<64x32xf32>
    %cst_8 = arith.constant dense<0.000000e+00> : vector<8x32xf32>
    %9 = tpu.matmul %7, %8, %cst_8 {dimension_numbers = #tpu.dot_dimension_numbers<[1], [0], [0], [1], [0, 0, 1, 1], [], []>} : vector<8x64xf32>, vector<64x32xf32>, vector<8x32xf32> -> vector<8x32xf32>
    %c0_9 = arith.constant 0 : index
    %c0_10 = arith.constant 0 : index
    %10 = vector.load %arg5[%c0_9, %c0_10] : memref<1x32xf32, #tpu.memory_space<vmem>>, vector<1x32xf32>
    %11 = vector.broadcast %10 : vector<1x32xf32> to vector<8x32xf32>
    %12 = arith.addf %9, %11 : vector<8x32xf32>
    %cst_11 = arith.constant 0.000000e+00 : f32
    %13 = vector.broadcast %cst_11 : f32 to vector<8x32xf32>
    %14 = arith.maximumf %12, %13 : vector<8x32xf32>
    %c0_12 = arith.constant 0 : index
    %c0_13 = arith.constant 0 : index
    %15 = vector.load %arg6[%c0_12, %c0_13] : memref<32x4xf32, #tpu.memory_space<vmem>>, vector<32x4xf32>
    %cst_14 = arith.constant dense<0.000000e+00> : vector<8x4xf32>
    %16 = tpu.matmul %14, %15, %cst_14 {dimension_numbers = #tpu.dot_dimension_numbers<[1], [0], [0], [1], [0, 0, 1, 1], [], []>} : vector<8x32xf32>, vector<32x4xf32>, vector<8x4xf32> -> vector<8x4xf32>
    %c0_15 = arith.constant 0 : index
    %c0_16 = arith.constant 0 : index
    %17 = vector.load %arg7[%c0_15, %c0_16] : memref<1x4xf32, #tpu.memory_space<vmem>>, vector<1x4xf32>
    %18 = vector.broadcast %17 : vector<1x4xf32> to vector<8x4xf32>
    %19 = arith.addf %16, %18 : vector<8x4xf32>
    %c0_17 = arith.constant 0 : index
    %c0_18 = arith.constant 0 : index
    %20 = vector.load %arg8[%c0_17, %c0_18] : memref<8x4xf32, #tpu.memory_space<vmem>>, vector<8x4xf32>
    tpu.vector_store %arg8[%c0_17, %c0_18], %19 {strides = array<i32>} : memref<8x4xf32, #tpu.memory_space<vmem>>, vector<8x4xf32>,
    return
  }
  func.func @transform_0(%arg0: i32) -> (i32, i32) {
    %c0_i32 = arith.constant 0 : i32
    %c0_i32_0 = arith.constant 0 : i32
    return %arg0, %c0_i32 : i32, i32
  }
  func.func @transform_1(%arg0: i32) -> (i32, i32) {
    %c0_i32 = arith.constant 0 : i32
    %c0_i32_0 = arith.constant 0 : i32
    %c0_i32_1 = arith.constant 0 : i32
    return %c0_i32, %c0_i32_0 : i32, i32
  }
  func.func @transform_2(%arg0: i32) -> (i32, i32) {
    %c0_i32 = arith.constant 0 : i32
    %c0_i32_0 = arith.constant 0 : i32
    %c0_i32_1 = arith.constant 0 : i32
    return %c0_i32, %c0_i32_0 : i32, i32
  }
  func.func @transform_3(%arg0: i32) -> (i32, i32) {
    %c0_i32 = arith.constant 0 : i32
    %c0_i32_0 = arith.constant 0 : i32
    %c0_i32_1 = arith.constant 0 : i32
    return %c0_i32, %c0_i32_0 : i32, i32
  }
  func.func @transform_4(%arg0: i32) -> (i32, i32) {
    %c0_i32 = arith.constant 0 : i32
    %c0_i32_0 = arith.constant 0 : i32
    %c0_i32_1 = arith.constant 0 : i32
    return %c0_i32, %c0_i32_0 : i32, i32
  }
  func.func @transform_5(%arg0: i32) -> (i32, i32) {
    %c0_i32 = arith.constant 0 : i32
    %c0_i32_0 = arith.constant 0 : i32
    %c0_i32_1 = arith.constant 0 : i32
    return %c0_i32, %c0_i32_0 : i32, i32
  }
  func.func @transform_6(%arg0: i32) -> (i32, i32) {
    %c0_i32 = arith.constant 0 : i32
    %c0_i32_0 = arith.constant 0 : i32
    %c0_i32_1 = arith.constant 0 : i32
    return %c0_i32, %c0_i32_0 : i32, i32
  }
  func.func @transform_7(%arg0: i32) -> (i32, i32) {
    %c0_i32 = arith.constant 0 : i32
    %c0_i32_0 = arith.constant 0 : i32
    return %arg0, %c0_i32 : i32, i32
  }
}

</mosaic_0001>

<bundles_post_ra>
// kernel: tpu_custom_call.1
= control target key start
LH: loop header
LB: loop body
LE: loop exit
PB: predicated region body
PF: predicated region fallthrough
CT: control target
= control target key end

     0   :  { %vm33_vm0 = vcmask 130048   ;;  %vm70_vm1 = vcmask 523264   ;;  %vm103_vm2 = vcmask 261120   ;;  %vm127_vm3 = vcmask 31744   ;;  %s236_s1 = inlined_call_operand.vmem [shape: f32[16,64], index: 1, kind: input, shape index: {}]   ;;  %s237_s0 = inlined_call_operand.vmem [shape: f32[8,16], index: 0, kind: input, shape index: {}]   ;;  %s238_s3 = inlined_call_operand.vmem [shape: f32[64,32], index: 3, kind: input, shape index: {}]   ;;  %s239_s2 = inlined_call_operand.vmem [shape: f32[1,64], index: 2, kind: input, shape index: {}]   ;;  %s240_s4 = inlined_call_operand.vmem [shape: f32[1,32], index: 4, kind: input, shape index: {}]   ;;  %s241_s5 = inlined_call_operand.vmem [shape: f32[32,4], index: 5, kind: input, shape index: {}]   ;;  %s242_s6 = inlined_call_operand.vmem [shape: f32[1,4], index: 6, kind: input, shape index: {}]   ;;  %s243_s7 = inlined_call_operand.vmem [shape: f32[8,4], index: 7, kind: output, shape index: {}]  }
   0x1   :  { %v28_v0 = vld [vmem:[%s236_s1 + $0x8] sm:$0xff]  ;;  %v27_v1 = vld [vmem:[%s236_s1] sm:$0xff]  ;;  %v65_v3 = vld [vmem:[%s238_s3 + $0x38] sm:$0xff] }
   0x2   :  { %51 = vmatpush.msra.mxu0 %v28_v0  ;;  %v26_v2 = vld [vmem:[%s237_s0] sm:$0xff]  ;;  %v64_v4 = vld [vmem:[%s238_s3 + $0x30] sm:$0xff]  ;;  %82 = vmatpush.msra.mxu1 %v65_v3  ;;  %v63_v5 = vld [vmem:[%s238_s3 + $0x28] sm:$0xff] }
   0x3   :  { %v62_v6 = vld [vmem:[%s238_s3 + $0x20] sm:$0xff]  ;;  %v61_v7 = vld [vmem:[%s238_s3 + $0x18] sm:$0xff]  ;;  %v60_v8 = vld [vmem:[%s238_s3 + $0x10] sm:$0xff] }
   0x4   :  { %52 = vmatpush.msra.mxu0 %v27_v1  ;;  %83 = vmatpush.msra.mxu1 %v64_v4  ;;  %v59_v9 = vld [vmem:[%s238_s3 + $0x8] sm:$0xff]  ;;  %v58_v10 = vld [vmem:[%s238_s3] sm:$0xff]  ;;  %v98_v11 = vld [vmem:[%s241_s5 + $0x18] sm:$0xff] }
   0x5   :  { %133 = vmatmul.msk.f32.vlgmr.msra.gmra.mxu0 %vm33_vm0, %v26_v2  ;;  %119 = vmatpush.msra.mxu2 %v98_v11  ;;  %v136_v12 = vld [vmem:[%s239_s2] ss:$0 sm:$0xff]  ;;  %v97_v16 = vld [vmem:[%s241_s5 + $0x10] sm:$0xff]  ;;  %v96_v17 = vld [vmem:[%s241_s5 + $0x8] sm:$0xff] }
   0x6   :  { %84 = vmatpush.msra.mxu1 %v63_v5  ;;  %v95_v18 = vld [vmem:[%s241_s5] sm:$0xff] }
   0x7   :  { %120 = vmatpush.msra.mxu2 %v97_v16  ;;  %v137_v19 = vld [vmem:[%s240_s4] ss:$0 sm:$0xff] }
   0x8   :  { %85 = vmatpush.msra.mxu1 %v62_v6  ;;  %v138_v23 = vld [vmem:[%s242_s6] ss:$0 sm:$0xff] }
   0x9   :  { %121 = vmatpush.msra.mxu2 %v96_v17 }
   0xa   :  { %86 = vmatpush.msra.mxu1 %v61_v7 }
   0xb   :  { %122 = vmatpush.msra.mxu2 %v95_v18 }
   0xc   :  { %87 = vmatpush.msra.mxu1 %v60_v8 }
   0xe   :  { %88 = vmatpush.msra.mxu1 %v59_v9 }
  0x10   :  { %89 = vmatpush.msra.mxu1 %v58_v10 }
  0x82   :  { %v54_v13 = vpop.f32.mrf.mxu0 }
  0x83   :  { %v55_v14 = vadd.f32 %v136_v12, %v54_v13 }
  0x85   :  { %v57_v15 = vmax.f32 %v55_v14, 0.0 }
  0x87   :  { %134 = vmatmul.msk.f32.vlgmr.msra.gmra.mxu1 %vm70_vm1, %v57_v15 }
 0x104   :  { %v91_v20 = vpop.f32.mrf.mxu1 }
 0x105   :  { %v92_v21 = vadd.f32 %v137_v19, %v91_v20 }
 0x107   :  { %v94_v22 = vmax.f32 %v92_v21, 0.0 }
 0x109   :  { %135 = vmatmul.msk.f32.vlgmr.msra.gmra.mxu2 %vm103_vm2, %v94_v22 }
 0x18c   :  { %v124_v24 = vpop.f32.mrf.mxu2 }
 0x18d   :  { %v125_v25 = vadd.f32 %v138_v23, %v124_v24 }
 0x18f   :  { %128 = vst.msk [vmem:[%s243_s7] sm:$0xff] %vm127_vm3, %v125_v25 }

</bundles_post_ra>
